<compile_context>
chip_gen: v7x
topology: tpu7x:2x2x1
jax: 0.10.0
libtpu: 0.0.40
codegen_flags: <defaults>
</compile_context>

<pallas_src>
import functools
import math

import jax
import jax.numpy as jnp
from jax.experimental import pallas as pl
from jax.experimental.pallas import tpu as pltpu


def _layer_norm(x, gamma, beta, eps=1e-5):
    mu = jnp.mean(x, axis=-1, keepdims=True)
    var = jnp.mean((x - mu) ** 2, axis=-1, keepdims=True)
    return (x - mu) * jax.lax.rsqrt(var + eps) * gamma + beta


def decoder_layer_kernel(
    x_ref,
    wq_ref, bq_ref, wk_ref, bk_ref, wv_ref, bv_ref, wo_ref, bo_ref,
    g1_ref, be1_ref,
    w1_ref, b1_ref, w2_ref, b2_ref,
    g2_ref, be2_ref,
    out_ref, attn_ref,
    *, num_heads: int,
):
    x = x_ref[...].astype(jnp.float32)               # (S, E)
    S, E = x.shape
    dh = E // num_heads
    scale = 1.0 / math.sqrt(dh)

    # --- masked multi-head self-attention (bias folded right after each dot) ---
    q = jnp.dot(x, wq_ref[...], preferred_element_type=jnp.float32) + bq_ref[...]
    k = jnp.dot(x, wk_ref[...], preferred_element_type=jnp.float32) + bk_ref[...]
    v = jnp.dot(x, wv_ref[...], preferred_element_type=jnp.float32) + bv_ref[...]

    # causal mask built once with 2-D iota (no HBM traffic for the mask)
    row = jax.lax.broadcasted_iota(jnp.int32, (S, S), 0)
    col = jax.lax.broadcasted_iota(jnp.int32, (S, S), 1)
    causal = row >= col

    ctx_heads = []
    for h in range(num_heads):                       # static unrolled loop
        sl = slice(h * dh, (h + 1) * dh)
        q_h, k_h, v_h = q[:, sl], k[:, sl], v[:, sl]
        scores = jax.lax.dot_general(
            q_h, k_h, (((1,), (1,)), ((), ())),
            preferred_element_type=jnp.float32) * scale          # (S, S)
        scores = jnp.where(causal, scores, -1e9)
        m = jnp.max(scores, axis=-1, keepdims=True)
        e = jnp.exp(scores - m)
        attn_h = e / jnp.sum(e, axis=-1, keepdims=True)
        attn_ref[h] = attn_h.astype(attn_ref.dtype)
        ctx_heads.append(
            jnp.dot(attn_h, v_h, preferred_element_type=jnp.float32))
    context = jnp.concatenate(ctx_heads, axis=-1)                # (S, E)

    attn_out = jnp.dot(context, wo_ref[...],
                       preferred_element_type=jnp.float32) + bo_ref[...]

    # --- residual + LayerNorm 1 (f32 epilogue: safe on v5e, no bf16 VPU needed) ---
    y = _layer_norm(x + attn_out, g1_ref[...], be1_ref[...])

    # --- feed-forward (hidden dim zero-padded to 128 lanes in the wrapper) ---
    hdn = jnp.dot(y, w1_ref[...], preferred_element_type=jnp.float32) + b1_ref[...]
    hdn = jnp.maximum(hdn, 0.0)
    ff = jnp.dot(hdn, w2_ref[...], preferred_element_type=jnp.float32) + b2_ref[...]

    # --- residual + LayerNorm 2 ---
    out_ref[...] = _layer_norm(y + ff, g2_ref[...], be2_ref[...]).astype(out_ref.dtype)


def transformer_decoder_layer(x, params, num_heads):
    (wq, bq, wk, bk, wv, bv, wo, bo,
     g1, be1, w1, b1, w2, b2, g2, be2) = params
    B, S, E = x.shape
    H = w1.shape[1]

    # Pad FFN hidden dim to a lane-dense multiple of 128; the zero columns/rows
    # are mathematically inert (ReLU(0)=0 feeds zero rows of w2).
    Hp = ((H + 127) // 128) * 128
    w1p = jnp.zeros((E, Hp), w1.dtype).at[:, :H].set(w1)
    b1p = jnp.zeros((Hp,), b1.dtype).at[:H].set(b1)
    w2p = jnp.zeros((Hp, E), w2.dtype).at[:H, :].set(w2)

    row = lambda a: a.reshape(1, -1)
    args = (x,
            wq, row(bq), wk, row(bk), wv, row(bv), wo, row(bo),
            row(g1), row(be1),
            w1p, row(b1p), w2p, row(b2),
            row(g2), row(be2))

    x_spec = pl.BlockSpec((None, S, E), lambda b: (b, 0, 0))
    p_spec = lambda a: pl.BlockSpec(a.shape, lambda b: (0, 0))   # VMEM-resident params
    in_specs = [x_spec] + [p_spec(a) for a in args[1:]]

    out_specs = (
        pl.BlockSpec((None, S, E), lambda b: (b, 0, 0)),
        pl.BlockSpec((None, num_heads, S, S), lambda b: (b, 0, 0, 0)),
    )
    out_shape = (
        jax.ShapeDtypeStruct((B, S, E), x.dtype),
        jax.ShapeDtypeStruct((B, num_heads, S, S), jnp.float32),
    )

    # Advisory cost estimate so XLA schedules the custom call sensibly.
    flops = B * (2 * S * E * E * 4 + 4 * S * S * E + 4 * S * E * Hp)
    transcendentals = B * (num_heads * S * S + 2 * S)
    bytes_accessed = sum(int(a.size) * a.dtype.itemsize for a in args)
    bytes_accessed += B * S * E * 4 + B * num_heads * S * S * 4

    kernel = functools.partial(decoder_layer_kernel, num_heads=num_heads)
    return pl.pallas_call(
        kernel,
        grid=(B,),
        in_specs=in_specs,
        out_specs=out_specs,
        out_shape=out_shape,
        compiler_params=pltpu.CompilerParams(
            dimension_semantics=("parallel",)),   # shards batch over 2 TCs on v7x
        cost_estimate=pl.CostEstimate(
            flops=flops, transcendentals=transcendentals,
            bytes_accessed=bytes_accessed),
    )(*args)


def init_params(key, E, H):
    def linear(k, fan_in, fan_out):
        kw, kb = jax.random.split(k)
        bound = 1.0 / math.sqrt(fan_in)
        w = jax.random.uniform(kw, (fan_in, fan_out), jnp.float32, -bound, bound)
        b = jax.random.uniform(kb, (fan_out,), jnp.float32, -bound, bound)
        return w, b
    keys = jax.random.split(key, 6)
    wq, bq = linear(keys[0], E, E)
    wk, bk = linear(keys[1], E, E)
    wv, bv = linear(keys[2], E, E)
    wo, bo = linear(keys[3], E, E)
    w1, b1 = linear(keys[4], E, H)
    w2, b2 = linear(keys[5], H, E)
    g1 = jnp.ones((E,), jnp.float32); be1 = jnp.zeros((E,), jnp.float32)
    g2 = jnp.ones((E,), jnp.float32); be2 = jnp.zeros((E,), jnp.float32)
    return (wq, bq, wk, bk, wv, bv, wo, bo, g1, be1, w1, b1, w2, b2, g2, be2)


def reference(x, params, num_heads):
    """Pure-JAX reference of the PyTorch TransformerDecoderLayer forward."""
    (wq, bq, wk, bk, wv, bv, wo, bo,
     g1, be1, w1, b1, w2, b2, g2, be2) = params
    B, S, E = x.shape
    dh = E // num_heads
    with jax.default_matmul_precision("highest"):
        heads = lambda t: t.reshape(B, S, num_heads, dh).transpose(0, 2, 1, 3)
        q = heads(x @ wq + bq)
        k = heads(x @ wk + bk)
        v = heads(x @ wv + bv)
        scores = jnp.einsum('bhqd,bhkd->bhqk', q, k) / jnp.sqrt(jnp.float32(dh))
        mask = jnp.tril(jnp.ones((S, S), jnp.float32))[None, None]
        scores = jnp.where(mask == 0, -1e9, scores)
        attn = jax.nn.softmax(scores, axis=-1)
        ctx = jnp.einsum('bhqk,bhkd->bhqd', attn, v).transpose(0, 2, 1, 3).reshape(B, S, E)
        attn_out = ctx @ wo + bo

        def ln(t, g, b):
            mu = t.mean(-1, keepdims=True)
            var = ((t - mu) ** 2).mean(-1, keepdims=True)
            return (t - mu) / jnp.sqrt(var + 1e-5) * g + b

        y = ln(x + attn_out, g1, be1)
        ff = jnp.maximum(y @ w1 + b1, 0.0) @ w2 + b2
        out = ln(y + ff, g2, be2)
    return out, attn


if __name__ == "__main__":
    embedding_dim, num_heads, hidden_dim = 32, 4, 100   # hidden_dim matches PyTorch default
    batch, seq = 2, 8

    key = jax.random.PRNGKey(0)
    k_x, k_p = jax.random.split(key)
    x = jax.random.normal(k_x, (batch, seq, embedding_dim), jnp.float32)
    params = init_params(k_p, embedding_dim, hidden_dim)

    out, attn = transformer_decoder_layer(x, params, num_heads)
    jax.block_until_ready((out, attn))

    ref_out, ref_attn = reference(x, params, num_heads)
    assert out.shape == (batch, seq, embedding_dim)
    assert attn.shape == (batch, num_heads, seq, seq)
    assert jnp.allclose(out, ref_out, atol=1e-3, rtol=1e-3), "output mismatch vs reference"
    assert jnp.allclose(attn, ref_attn, atol=1e-4, rtol=1e-3), "attn mismatch vs reference"
    print("KERNEL_OK")
</pallas_src>

<mosaic_0001>
module attributes {stable_mosaic.version = 11 : i64} {
  func.func @decoder_layer_kernel(%arg0: i32, %arg1: memref<1x8x32xf32, #tpu.memory_space<vmem>>, %arg2: memref<32x32xf32, #tpu.memory_space<vmem>>, %arg3: memref<1x32xf32, #tpu.memory_space<vmem>>, %arg4: memref<32x32xf32, #tpu.memory_space<vmem>>, %arg5: memref<1x32xf32, #tpu.memory_space<vmem>>, %arg6: memref<32x32xf32, #tpu.memory_space<vmem>>, %arg7: memref<1x32xf32, #tpu.memory_space<vmem>>, %arg8: memref<32x32xf32, #tpu.memory_space<vmem>>, %arg9: memref<1x32xf32, #tpu.memory_space<vmem>>, %arg10: memref<1x32xf32, #tpu.memory_space<vmem>>, %arg11: memref<1x32xf32, #tpu.memory_space<vmem>>, %arg12: memref<32x128xf32, #tpu.memory_space<vmem>>, %arg13: memref<1x128xf32, #tpu.memory_space<vmem>>, %arg14: memref<128x32xf32, #tpu.memory_space<vmem>>, %arg15: memref<1x32xf32, #tpu.memory_space<vmem>>, %arg16: memref<1x32xf32, #tpu.memory_space<vmem>>, %arg17: memref<1x32xf32, #tpu.memory_space<vmem>>, %arg18: memref<1x8x32xf32, #tpu.memory_space<vmem>>, %arg19: memref<1x4x8x8xf32, #tpu.memory_space<vmem>>) attributes {dimension_semantics = [#tpu.dimension_semantics<parallel>], iteration_bounds = array<i64: 2>, scalar_prefetch = 0 : i64, scratch_operands = 0 : i64, tpu.core_type = #tpu.core_type<tc>, window_params = [{transform_indices = @transform_0, window_bounds = array<i64: 1, 8, 32>}, {pipeline_mode = #tpu.pipeline_mode<synchronous>, transform_indices = @transform_1, window_bounds = array<i64: 32, 32>}, {pipeline_mode = #tpu.pipeline_mode<synchronous>, transform_indices = @transform_2, window_bounds = array<i64: 1, 32>}, {pipeline_mode = #tpu.pipeline_mode<synchronous>, transform_indices = @transform_3, window_bounds = array<i64: 32, 32>}, {pipeline_mode = #tpu.pipeline_mode<synchronous>, transform_indices = @transform_4, window_bounds = array<i64: 1, 32>}, {pipeline_mode = #tpu.pipeline_mode<synchronous>, transform_indices = @transform_5, window_bounds = array<i64: 32, 32>}, {pipeline_mode = #tpu.pipeline_mode<synchronous>, transform_indices = @transform_6, window_bounds = array<i64: 1, 32>}, {pipeline_mode = #tpu.pipeline_mode<synchronous>, transform_indices = @transform_7, window_bounds = array<i64: 32, 32>}, {pipeline_mode = #tpu.pipeline_mode<synchronous>, transform_indices = @transform_8, window_bounds = array<i64: 1, 32>}, {pipeline_mode = #tpu.pipeline_mode<synchronous>, transform_indices = @transform_9, window_bounds = array<i64: 1, 32>}, {pipeline_mode = #tpu.pipeline_mode<synchronous>, transform_indices = @transform_10, window_bounds = array<i64: 1, 32>}, {pipeline_mode = #tpu.pipeline_mode<synchronous>, transform_indices = @transform_11, window_bounds = array<i64: 32, 128>}, {pipeline_mode = #tpu.pipeline_mode<synchronous>, transform_indices = @transform_12, window_bounds = array<i64: 1, 128>}, {pipeline_mode = #tpu.pipeline_mode<synchronous>, transform_indices = @transform_13, window_bounds = array<i64: 128, 32>}, {pipeline_mode = #tpu.pipeline_mode<synchronous>, transform_indices = @transform_14, window_bounds = array<i64: 1, 32>}, {pipeline_mode = #tpu.pipeline_mode<synchronous>, transform_indices = @transform_15, window_bounds = array<i64: 1, 32>}, {pipeline_mode = #tpu.pipeline_mode<synchronous>, transform_indices = @transform_16, window_bounds = array<i64: 1, 32>}, {transform_indices = @transform_17, window_bounds = array<i64: 1, 8, 32>}, {transform_indices = @transform_18, window_bounds = array<i64: 1, 4, 8, 8>}]} {
    %c0 = arith.constant 0 : index
    %c0_0 = arith.constant 0 : index
    %c0_1 = arith.constant 0 : index
    %0 = vector.load %arg1[%c0, %c0_0, %c0_1] : memref<1x8x32xf32, #tpu.memory_space<vmem>>, vector<1x8x32xf32>
    %1 = vector.shape_cast %0 : vector<1x8x32xf32> to vector<8x32xf32>
    %c0_2 = arith.constant 0 : index
    %c0_3 = arith.constant 0 : index
    %2 = vector.load %arg2[%c0_2, %c0_3] : memref<32x32xf32, #tpu.memory_space<vmem>>, vector<32x32xf32>
    %cst = arith.constant dense<0.000000e+00> : vector<8x32xf32>
    %3 = tpu.matmul %1, %2, %cst {dimension_numbers = #tpu.dot_dimension_numbers<[1], [0], [0], [1], [0, 0, 1, 1], [], []>} : vector<8x32xf32>, vector<32x32xf32>, vector<8x32xf32> -> vector<8x32xf32>
    %c0_4 = arith.constant 0 : index
    %c0_5 = arith.constant 0 : index
    %4 = vector.load %arg3[%c0_4, %c0_5] : memref<1x32xf32, #tpu.memory_space<vmem>>, vector<1x32xf32>
    %5 = vector.broadcast %4 : vector<1x32xf32> to vector<8x32xf32>
    %6 = arith.addf %3, %5 : vector<8x32xf32>
    %c0_6 = arith.constant 0 : index
    %c0_7 = arith.constant 0 : index
    %7 = vector.load %arg4[%c0_6, %c0_7] : memref<32x32xf32, #tpu.memory_space<vmem>>, vector<32x32xf32>
    %cst_8 = arith.constant dense<0.000000e+00> : vector<8x32xf32>
    %8 = tpu.matmul %1, %7, %cst_8 {dimension_numbers = #tpu.dot_dimension_numbers<[1], [0], [0], [1], [0, 0, 1, 1], [], []>} : vector<8x32xf32>, vector<32x32xf32>, vector<8x32xf32> -> vector<8x32xf32>
    %c0_9 = arith.constant 0 : index
    %c0_10 = arith.constant 0 : index
    %9 = vector.load %arg5[%c0_9, %c0_10] : memref<1x32xf32, #tpu.memory_space<vmem>>, vector<1x32xf32>
    %10 = vector.broadcast %9 : vector<1x32xf32> to vector<8x32xf32>
    %11 = arith.addf %8, %10 : vector<8x32xf32>
    %c0_11 = arith.constant 0 : index
    %c0_12 = arith.constant 0 : index
    %12 = vector.load %arg6[%c0_11, %c0_12] : memref<32x32xf32, #tpu.memory_space<vmem>>, vector<32x32xf32>
    %cst_13 = arith.constant dense<0.000000e+00> : vector<8x32xf32>
    %13 = tpu.matmul %1, %12, %cst_13 {dimension_numbers = #tpu.dot_dimension_numbers<[1], [0], [0], [1], [0, 0, 1, 1], [], []>} : vector<8x32xf32>, vector<32x32xf32>, vector<8x32xf32> -> vector<8x32xf32>
    %c0_14 = arith.constant 0 : index
    %c0_15 = arith.constant 0 : index
    %14 = vector.load %arg7[%c0_14, %c0_15] : memref<1x32xf32, #tpu.memory_space<vmem>>, vector<1x32xf32>
    %15 = vector.broadcast %14 : vector<1x32xf32> to vector<8x32xf32>
    %16 = arith.addf %13, %15 : vector<8x32xf32>
    %17 = tpu.iota {dimensions = array<i32: 0>} : vector<8x8xi32>
    %18 = tpu.iota {dimensions = array<i32: 1>} : vector<8x8xi32>
    %19 = arith.cmpi sge, %17, %18 : vector<8x8xi32>
    %20 = vector.extract_strided_slice %6 {offsets = [0, 0], sizes = [8, 8], strides = [1, 1]} : vector<8x32xf32> to vector<8x8xf32>
    %21 = vector.extract_strided_slice %11 {offsets = [0, 0], sizes = [8, 8], strides = [1, 1]} : vector<8x32xf32> to vector<8x8xf32>
    %22 = vector.extract_strided_slice %16 {offsets = [0, 0], sizes = [8, 8], strides = [1, 1]} : vector<8x32xf32> to vector<8x8xf32>
    %cst_16 = arith.constant dense<0.000000e+00> : vector<8x8xf32>
    %23 = tpu.matmul %20, %21, %cst_16 {dimension_numbers = #tpu.dot_dimension_numbers<[1], [1], [0], [0], [0, 0, 1, 0], [], []>} : vector<8x8xf32>, vector<8x8xf32>, vector<8x8xf32> -> vector<8x8xf32>
    %cst_17 = arith.constant 0.353553385 : f32
    %24 = vector.broadcast %cst_17 : f32 to vector<8x8xf32>
    %25 = arith.mulf %23, %24 : vector<8x8xf32>
    %cst_18 = arith.constant -1.000000e+09 : f32
    %26 = vector.broadcast %cst_18 : f32 to vector<8x8xf32>
    %27 = arith.select %19, %25, %26 : vector<8x8xi1>, vector<8x8xf32>
    %cst_19 = arith.constant dense<0xFF800000> : vector<8xf32>
    %28 = vector.multi_reduction <maximumf>, %27, %cst_19 [1] : vector<8x8xf32> to vector<8xf32>
    %29 = vector.shape_cast %28 : vector<8xf32> to vector<8x1xf32>
    %30 = vector.broadcast %29 : vector<8x1xf32> to vector<8x8xf32>
    %31 = arith.subf %27, %30 : vector<8x8xf32>
    %32 = math.exp %31 : vector<8x8xf32>
    %cst_20 = arith.constant dense<0.000000e+00> : vector<8xf32>
    %33 = vector.multi_reduction <add>, %32, %cst_20 [1] : vector<8x8xf32> to vector<8xf32>
    %34 = vector.shape_cast %33 : vector<8xf32> to vector<8x1xf32>
    %35 = vector.broadcast %34 : vector<8x1xf32> to vector<8x8xf32>
    %36 = arith.divf %32, %35 : vector<8x8xf32>
    %c0_21 = arith.constant 0 : index
    %c0_22 = arith.constant 0 : index
    %c0_23 = arith.constant 0 : index
    %c0_24 = arith.constant 0 : index
    %37 = vector.load %arg19[%c0_21, %c0_22, %c0_23, %c0_24] : memref<1x4x8x8xf32, #tpu.memory_space<vmem>>, vector<1x1x8x8xf32>
    %38 = vector.shape_cast %37 : vector<1x1x8x8xf32> to vector<8x8xf32>
    %39 = vector.shape_cast %36 : vector<8x8xf32> to vector<1x1x8x8xf32>
    tpu.vector_store %arg19[%c0_21, %c0_22, %c0_23, %c0_24], %39 {strides = array<i32>} : memref<1x4x8x8xf32, #tpu.memory_space<vmem>>, vector<1x1x8x8xf32>,
    %cst_25 = arith.constant dense<0.000000e+00> : vector<8x8xf32>
    %40 = tpu.matmul %36, %22, %cst_25 {dimension_numbers = #tpu.dot_dimension_numbers<[1], [0], [0], [1], [0, 0, 1, 1], [], []>} : vector<8x8xf32>, vector<8x8xf32>, vector<8x8xf32> -> vector<8x8xf32>
    %41 = vector.extract_strided_slice %6 {offsets = [0, 8], sizes = [8, 8], strides = [1, 1]} : vector<8x32xf32> to vector<8x8xf32>
    %42 = vector.extract_strided_slice %11 {offsets = [0, 8], sizes = [8, 8], strides = [1, 1]} : vector<8x32xf32> to vector<8x8xf32>
    %43 = vector.extract_strided_slice %16 {offsets = [0, 8], sizes = [8, 8], strides = [1, 1]} : vector<8x32xf32> to vector<8x8xf32>
    %cst_26 = arith.constant dense<0.000000e+00> : vector<8x8xf32>
    %44 = tpu.matmul %41, %42, %cst_26 {dimension_numbers = #tpu.dot_dimension_numbers<[1], [1], [0], [0], [0, 0, 1, 0], [], []>} : vector<8x8xf32>, vector<8x8xf32>, vector<8x8xf32> -> vector<8x8xf32>
    %cst_27 = arith.constant 0.353553385 : f32
    %45 = vector.broadcast %cst_27 : f32 to vector<8x8xf32>
    %46 = arith.mulf %44, %45 : vector<8x8xf32>
    %cst_28 = arith.constant -1.000000e+09 : f32
    %47 = vector.broadcast %cst_28 : f32 to vector<8x8xf32>
    %48 = arith.select %19, %46, %47 : vector<8x8xi1>, vector<8x8xf32>
    %cst_29 = arith.constant dense<0xFF800000> : vector<8xf32>
    %49 = vector.multi_reduction <maximumf>, %48, %cst_29 [1] : vector<8x8xf32> to vector<8xf32>
    %50 = vector.shape_cast %49 : vector<8xf32> to vector<8x1xf32>
    %51 = vector.broadcast %50 : vector<8x1xf32> to vector<8x8xf32>
    %52 = arith.subf %48, %51 : vector<8x8xf32>
    %53 = math.exp %52 : vector<8x8xf32>
    %cst_30 = arith.constant dense<0.000000e+00> : vector<8xf32>
    %54 = vector.multi_reduction <add>, %53, %cst_30 [1] : vector<8x8xf32> to vector<8xf32>
    %55 = vector.shape_cast %54 : vector<8xf32> to vector<8x1xf32>
    %56 = vector.broadcast %55 : vector<8x1xf32> to vector<8x8xf32>
    %57 = arith.divf %53, %56 : vector<8x8xf32>
    %c0_31 = arith.constant 0 : index
    %c1 = arith.constant 1 : index
    %c0_32 = arith.constant 0 : index
    %c0_33 = arith.constant 0 : index
    %58 = vector.load %arg19[%c0_31, %c1, %c0_32, %c0_33] : memref<1x4x8x8xf32, #tpu.memory_space<vmem>>, vector<1x1x8x8xf32>
    %59 = vector.shape_cast %58 : vector<1x1x8x8xf32> to vector<8x8xf32>
    %60 = vector.shape_cast %57 : vector<8x8xf32> to vector<1x1x8x8xf32>
    tpu.vector_store %arg19[%c0_31, %c1, %c0_32, %c0_33], %60 {strides = array<i32>} : memref<1x4x8x8xf32, #tpu.memory_space<vmem>>, vector<1x1x8x8xf32>,
    %cst_34 = arith.constant dense<0.000000e+00> : vector<8x8xf32>
    %61 = tpu.matmul %57, %43, %cst_34 {dimension_numbers = #tpu.dot_dimension_numbers<[1], [0], [0], [1], [0, 0, 1, 1], [], []>} : vector<8x8xf32>, vector<8x8xf32>, vector<8x8xf32> -> vector<8x8xf32>
    %62 = vector.extract_strided_slice %6 {offsets = [0, 16], sizes = [8, 8], strides = [1, 1]} : vector<8x32xf32> to vector<8x8xf32>
    %63 = vector.extract_strided_slice %11 {offsets = [0, 16], sizes = [8, 8], strides = [1, 1]} : vector<8x32xf32> to vector<8x8xf32>
    %64 = vector.extract_strided_slice %16 {offsets = [0, 16], sizes = [8, 8], strides = [1, 1]} : vector<8x32xf32> to vector<8x8xf32>
    %cst_35 = arith.constant dense<0.000000e+00> : vector<8x8xf32>
    %65 = tpu.matmul %62, %63, %cst_35 {dimension_numbers = #tpu.dot_dimension_numbers<[1], [1], [0], [0], [0, 0, 1, 0], [], []>} : vector<8x8xf32>, vector<8x8xf32>, vector<8x8xf32> -> vector<8x8xf32>
    %cst_36 = arith.constant 0.353553385 : f32
    %66 = vector.broadcast %cst_36 : f32 to vector<8x8xf32>
    %67 = arith.mulf %65, %66 : vector<8x8xf32>
    %cst_37 = arith.constant -1.000000e+09 : f32
    %68 = vector.broadcast %cst_37 : f32 to vector<8x8xf32>
    %69 = arith.select %19, %67, %68 : vector<8x8xi1>, vector<8x8xf32>
    %cst_38 = arith.constant dense<0xFF800000> : vector<8xf32>
    %70 = vector.multi_reduction <maximumf>, %69, %cst_38 [1] : vector<8x8xf32> to vector<8xf32>
    %71 = vector.shape_cast %70 : vector<8xf32> to vector<8x1xf32>
    %72 = vector.broadcast %71 : vector<8x1xf32> to vector<8x8xf32>
    %73 = arith.subf %69, %72 : vector<8x8xf32>
    %74 = math.exp %73 : vector<8x8xf32>
    %cst_39 = arith.constant dense<0.000000e+00> : vector<8xf32>
    %75 = vector.multi_reduction <add>, %74, %cst_39 [1] : vector<8x8xf32> to vector<8xf32>
    %76 = vector.shape_cast %75 : vector<8xf32> to vector<8x1xf32>
    %77 = vector.broadcast %76 : vector<8x1xf32> to vector<8x8xf32>
    %78 = arith.divf %74, %77 : vector<8x8xf32>
    %c0_40 = arith.constant 0 : index
    %c2 = arith.constant 2 : index
    %c0_41 = arith.constant 0 : index
    %c0_42 = arith.constant 0 : index
    %79 = vector.load %arg19[%c0_40, %c2, %c0_41, %c0_42] : memref<1x4x8x8xf32, #tpu.memory_space<vmem>>, vector<1x1x8x8xf32>
    %80 = vector.shape_cast %79 : vector<1x1x8x8xf32> to vector<8x8xf32>
    %81 = vector.shape_cast %78 : vector<8x8xf32> to vector<1x1x8x8xf32>
    tpu.vector_store %arg19[%c0_40, %c2, %c0_41, %c0_42], %81 {strides = array<i32>} : memref<1x4x8x8xf32, #tpu.memory_space<vmem>>, vector<1x1x8x8xf32>,
    %cst_43 = arith.constant dense<0.000000e+00> : vector<8x8xf32>
    %82 = tpu.matmul %78, %64, %cst_43 {dimension_numbers = #tpu.dot_dimension_numbers<[1], [0], [0], [1], [0, 0, 1, 1], [], []>} : vector<8x8xf32>, vector<8x8xf32>, vector<8x8xf32> -> vector<8x8xf32>
    %83 = vector.extract_strided_slice %6 {offsets = [0, 24], sizes = [8, 8], strides = [1, 1]} : vector<8x32xf32> to vector<8x8xf32>
    %84 = vector.extract_strided_slice %11 {offsets = [0, 24], sizes = [8, 8], strides = [1, 1]} : vector<8x32xf32> to vector<8x8xf32>
    %85 = vector.extract_strided_slice %16 {offsets = [0, 24], sizes = [8, 8], strides = [1, 1]} : vector<8x32xf32> to vector<8x8xf32>
    %cst_44 = arith.constant dense<0.000000e+00> : vector<8x8xf32>
    %86 = tpu.matmul %83, %84, %cst_44 {dimension_numbers = #tpu.dot_dimension_numbers<[1], [1], [0], [0], [0, 0, 1, 0], [], []>} : vector<8x8xf32>, vector<8x8xf32>, vector<8x8xf32> -> vector<8x8xf32>
    %cst_45 = arith.constant 0.353553385 : f32
    %87 = vector.broadcast %cst_45 : f32 to vector<8x8xf32>
    %88 = arith.mulf %86, %87 : vector<8x8xf32>
    %cst_46 = arith.constant -1.000000e+09 : f32
    %89 = vector.broadcast %cst_46 : f32 to vector<8x8xf32>
    %90 = arith.select %19, %88, %89 : vector<8x8xi1>, vector<8x8xf32>
    %cst_47 = arith.constant dense<0xFF800000> : vector<8xf32>
    %91 = vector.multi_reduction <maximumf>, %90, %cst_47 [1] : vector<8x8xf32> to vector<8xf32>
    %92 = vector.shape_cast %91 : vector<8xf32> to vector<8x1xf32>
    %93 = vector.broadcast %92 : vector<8x1xf32> to vector<8x8xf32>
    %94 = arith.subf %90, %93 : vector<8x8xf32>
    %95 = math.exp %94 : vector<8x8xf32>
    %cst_48 = arith.constant dense<0.000000e+00> : vector<8xf32>
    %96 = vector.multi_reduction <add>, %95, %cst_48 [1] : vector<8x8xf32> to vector<8xf32>
    %97 = vector.shape_cast %96 : vector<8xf32> to vector<8x1xf32>
    %98 = vector.broadcast %97 : vector<8x1xf32> to vector<8x8xf32>
    %99 = arith.divf %95, %98 : vector<8x8xf32>
    %c0_49 = arith.constant 0 : index
    %c3 = arith.constant 3 : index
    %c0_50 = arith.constant 0 : index
    %c0_51 = arith.constant 0 : index
    %100 = vector.load %arg19[%c0_49, %c3, %c0_50, %c0_51] : memref<1x4x8x8xf32, #tpu.memory_space<vmem>>, vector<1x1x8x8xf32>
    %101 = vector.shape_cast %100 : vector<1x1x8x8xf32> to vector<8x8xf32>
    %102 = vector.shape_cast %99 : vector<8x8xf32> to vector<1x1x8x8xf32>
    tpu.vector_store %arg19[%c0_49, %c3, %c0_50, %c0_51], %102 {strides = array<i32>} : memref<1x4x8x8xf32, #tpu.memory_space<vmem>>, vector<1x1x8x8xf32>,
    %cst_52 = arith.constant dense<0.000000e+00> : vector<8x8xf32>
    %103 = tpu.matmul %99, %85, %cst_52 {dimension_numbers = #tpu.dot_dimension_numbers<[1], [0], [0], [1], [0, 0, 1, 1], [], []>} : vector<8x8xf32>, vector<8x8xf32>, vector<8x8xf32> -> vector<8x8xf32>
    %104 = tpu.concatenate %40, %61, %82, %103 in 1 : vector<8x8xf32>, vector<8x8xf32>, vector<8x8xf32>, vector<8x8xf32> -> vector<8x32xf32>
    %c0_53 = arith.constant 0 : index
    %c0_54 = arith.constant 0 : index
    %105 = vector.load %arg8[%c0_53, %c0_54] : memref<32x32xf32, #tpu.memory_space<vmem>>, vector<32x32xf32>
    %cst_55 = arith.constant dense<0.000000e+00> : vector<8x32xf32>
    %106 = tpu.matmul %104, %105, %cst_55 {dimension_numbers = #tpu.dot_dimension_numbers<[1], [0], [0], [1], [0, 0, 1, 1], [], []>} : vector<8x32xf32>, vector<32x32xf32>, vector<8x32xf32> -> vector<8x32xf32>
    %c0_56 = arith.constant 0 : index
    %c0_57 = arith.constant 0 : index
    %107 = vector.load %arg9[%c0_56, %c0_57] : memref<1x32xf32, #tpu.memory_space<vmem>>, vector<1x32xf32>
    %108 = vector.broadcast %107 : vector<1x32xf32> to vector<8x32xf32>
    %109 = arith.addf %106, %108 : vector<8x32xf32>
    %110 = arith.addf %1, %109 : vector<8x32xf32>
    %c0_58 = arith.constant 0 : index
    %c0_59 = arith.constant 0 : index
    %111 = vector.load %arg10[%c0_58, %c0_59] : memref<1x32xf32, #tpu.memory_space<vmem>>, vector<1x32xf32>
    %c0_60 = arith.constant 0 : index
    %c0_61 = arith.constant 0 : index
    %112 = vector.load %arg11[%c0_60, %c0_61] : memref<1x32xf32, #tpu.memory_space<vmem>>, vector<1x32xf32>
    %cst_62 = arith.constant dense<0.000000e+00> : vector<8xf32>
    %113 = vector.multi_reduction <add>, %110, %cst_62 [1] : vector<8x32xf32> to vector<8xf32>
    %114 = vector.shape_cast %113 : vector<8xf32> to vector<8x1xf32>
    %cst_63 = arith.constant 3.200000e+01 : f32
    %115 = vector.broadcast %cst_63 : f32 to vector<8x1xf32>
    %116 = arith.divf %114, %115 : vector<8x1xf32>
    %117 = vector.broadcast %116 : vector<8x1xf32> to vector<8x32xf32>
    %118 = arith.subf %110, %117 : vector<8x32xf32>
    %119 = arith.mulf %118, %118 : vector<8x32xf32>
    %cst_64 = arith.constant dense<0.000000e+00> : vector<8xf32>
    %120 = vector.multi_reduction <add>, %119, %cst_64 [1] : vector<8x32xf32> to vector<8xf32>
    %121 = vector.shape_cast %120 : vector<8xf32> to vector<8x1xf32>
    %cst_65 = arith.constant 3.200000e+01 : f32
    %122 = vector.broadcast %cst_65 : f32 to vector<8x1xf32>
    %123 = arith.divf %121, %122 : vector<8x1xf32>
    %124 = vector.broadcast %116 : vector<8x1xf32> to vector<8x32xf32>
    %125 = arith.subf %110, %124 : vector<8x32xf32>
    %cst_66 = arith.constant 9.99999974E-6 : f32
    %126 = vector.broadcast %cst_66 : f32 to vector<8x1xf32>
    %127 = arith.addf %123, %126 : vector<8x1xf32>
    %128 = math.rsqrt %127 : vector<8x1xf32>
    %129 = vector.broadcast %128 : vector<8x1xf32> to vector<8x32xf32>
    %130 = arith.mulf %125, %129 : vector<8x32xf32>
    %131 = vector.broadcast %111 : vector<1x32xf32> to vector<8x32xf32>
    %132 = arith.mulf %130, %131 : vector<8x32xf32>
    %133 = vector.broadcast %112 : vector<1x32xf32> to vector<8x32xf32>
    %134 = arith.addf %132, %133 : vector<8x32xf32>
    %c0_67 = arith.constant 0 : index
    %c0_68 = arith.constant 0 : index
    %135 = vector.load %arg12[%c0_67, %c0_68] : memref<32x128xf32, #tpu.memory_space<vmem>>, vector<32x128xf32>
    %cst_69 = arith.constant dense<0.000000e+00> : vector<8x128xf32>
    %136 = tpu.matmul %134, %135, %cst_69 {dimension_numbers = #tpu.dot_dimension_numbers<[1], [0], [0], [1], [0, 0, 1, 1], [], []>} : vector<8x32xf32>, vector<32x128xf32>, vector<8x128xf32> -> vector<8x128xf32>
    %c0_70 = arith.constant 0 : index
    %c0_71 = arith.constant 0 : index
    %137 = vector.load %arg13[%c0_70, %c0_71] : memref<1x128xf32, #tpu.memory_space<vmem>>, vector<1x128xf32>
    %138 = vector.broadcast %137 : vector<1x128xf32> to vector<8x128xf32>
    %139 = arith.addf %136, %138 : vector<8x128xf32>
    %cst_72 = arith.constant 0.000000e+00 : f32
    %140 = vector.broadcast %cst_72 : f32 to vector<8x128xf32>
    %141 = arith.maximumf %139, %140 : vector<8x128xf32>
    %c0_73 = arith.constant 0 : index
    %c0_74 = arith.constant 0 : index
    %142 = vector.load %arg14[%c0_73, %c0_74] : memref<128x32xf32, #tpu.memory_space<vmem>>, vector<128x32xf32>
    %cst_75 = arith.constant dense<0.000000e+00> : vector<8x32xf32>
    %143 = tpu.matmul %141, %142, %cst_75 {dimension_numbers = #tpu.dot_dimension_numbers<[1], [0], [0], [1], [0, 0, 1, 1], [], []>} : vector<8x128xf32>, vector<128x32xf32>, vector<8x32xf32> -> vector<8x32xf32>
    %c0_76 = arith.constant 0 : index
    %c0_77 = arith.constant 0 : index
    %144 = vector.load %arg15[%c0_76, %c0_77] : memref<1x32xf32, #tpu.memory_space<vmem>>, vector<1x32xf32>
    %145 = vector.broadcast %144 : vector<1x32xf32> to vector<8x32xf32>
    %146 = arith.addf %143, %145 : vector<8x32xf32>
    %147 = arith.addf %134, %146 : vector<8x32xf32>
    %c0_78 = arith.constant 0 : index
    %c0_79 = arith.constant 0 : index
    %148 = vector.load %arg16[%c0_78, %c0_79] : memref<1x32xf32, #tpu.memory_space<vmem>>, vector<1x32xf32>
    %c0_80 = arith.constant 0 : index
    %c0_81 = arith.constant 0 : index
    %149 = vector.load %arg17[%c0_80, %c0_81] : memref<1x32xf32, #tpu.memory_space<vmem>>, vector<1x32xf32>
    %cst_82 = arith.constant dense<0.000000e+00> : vector<8xf32>
    %150 = vector.multi_reduction <add>, %147, %cst_82 [1] : vector<8x32xf32> to vector<8xf32>
    %151 = vector.shape_cast %150 : vector<8xf32> to vector<8x1xf32>
    %cst_83 = arith.constant 3.200000e+01 : f32
    %152 = vector.broadcast %cst_83 : f32 to vector<8x1xf32>
    %153 = arith.divf %151, %152 : vector<8x1xf32>
    %154 = vector.broadcast %153 : vector<8x1xf32> to vector<8x32xf32>
    %155 = arith.subf %147, %154 : vector<8x32xf32>
    %156 = arith.mulf %155, %155 : vector<8x32xf32>
    %cst_84 = arith.constant dense<0.000000e+00> : vector<8xf32>
    %157 = vector.multi_reduction <add>, %156, %cst_84 [1] : vector<8x32xf32> to vector<8xf32>
    %158 = vector.shape_cast %157 : vector<8xf32> to vector<8x1xf32>
    %cst_85 = arith.constant 3.200000e+01 : f32
    %159 = vector.broadcast %cst_85 : f32 to vector<8x1xf32>
    %160 = arith.divf %158, %159 : vector<8x1xf32>
    %161 = vector.broadcast %153 : vector<8x1xf32> to vector<8x32xf32>
    %162 = arith.subf %147, %161 : vector<8x32xf32>
    %cst_86 = arith.constant 9.99999974E-6 : f32
    %163 = vector.broadcast %cst_86 : f32 to vector<8x1xf32>
    %164 = arith.addf %160, %163 : vector<8x1xf32>
    %165 = math.rsqrt %164 : vector<8x1xf32>
    %166 = vector.broadcast %165 : vector<8x1xf32> to vector<8x32xf32>
    %167 = arith.mulf %162, %166 : vector<8x32xf32>
    %168 = vector.broadcast %148 : vector<1x32xf32> to vector<8x32xf32>
    %169 = arith.mulf %167, %168 : vector<8x32xf32>
    %170 = vector.broadcast %149 : vector<1x32xf32> to vector<8x32xf32>
    %171 = arith.addf %169, %170 : vector<8x32xf32>
    %c0_87 = arith.constant 0 : index
    %c0_88 = arith.constant 0 : index
    %c0_89 = arith.constant 0 : index
    %172 = vector.load %arg18[%c0_87, %c0_88, %c0_89] : memref<1x8x32xf32, #tpu.memory_space<vmem>>, vector<1x8x32xf32>
    %173 = vector.shape_cast %172 : vector<1x8x32xf32> to vector<8x32xf32>
    %174 = vector.shape_cast %171 : vector<8x32xf32> to vector<1x8x32xf32>
    tpu.vector_store %arg18[%c0_87, %c0_88, %c0_89], %174 {strides = array<i32>} : memref<1x8x32xf32, #tpu.memory_space<vmem>>, vector<1x8x32xf32>,
    return
  }
  func.func @transform_0(%arg0: i32) -> (i32, i32, i32) {
    %c0_i32 = arith.constant 0 : i32
    %c0_i32_0 = arith.constant 0 : i32
    %c0_i32_1 = arith.constant 0 : i32
    return %arg0, %c0_i32, %c0_i32_0 : i32, i32, i32
  }
  func.func @transform_1(%arg0: i32) -> (i32, i32) {
    %c0_i32 = arith.constant 0 : i32
    %c0_i32_0 = arith.constant 0 : i32
    %c0_i32_1 = arith.constant 0 : i32
    return %c0_i32, %c0_i32_0 : i32, i32
  }
  func.func @transform_2(%arg0: i32) -> (i32, i32) {
    %c0_i32 = arith.constant 0 : i32
    %c0_i32_0 = arith.constant 0 : i32
    %c0_i32_1 = arith.constant 0 : i32
    return %c0_i32, %c0_i32_0 : i32, i32
  }
  func.func @transform_3(%arg0: i32) -> (i32, i32) {
    %c0_i32 = arith.constant 0 : i32
    %c0_i32_0 = arith.constant 0 : i32
    %c0_i32_1 = arith.constant 0 : i32
    return %c0_i32, %c0_i32_0 : i32, i32
  }
  func.func @transform_4(%arg0: i32) -> (i32, i32) {
    %c0_i32 = arith.constant 0 : i32
    %c0_i32_0 = arith.constant 0 : i32
    %c0_i32_1 = arith.constant 0 : i32
    return %c0_i32, %c0_i32_0 : i32, i32
  }
  func.func @transform_5(%arg0: i32) -> (i32, i32) {
    %c0_i32 = arith.constant 0 : i32
    %c0_i32_0 = arith.constant 0 : i32
    %c0_i32_1 = arith.constant 0 : i32
    return %c0_i32, %c0_i32_0 : i32, i32
  }
  func.func @transform_6(%arg0: i32) -> (i32, i32) {
    %c0_i32 = arith.constant 0 : i32
    %c0_i32_0 = arith.constant 0 : i32
    %c0_i32_1 = arith.constant 0 : i32
    return %c0_i32, %c0_i32_0 : i32, i32
  }
  func.func @transform_7(%arg0: i32) -> (i32, i32) {
    %c0_i32 = arith.constant 0 : i32
    %c0_i32_0 = arith.constant 0 : i32
    %c0_i32_1 = arith.constant 0 : i32
    return %c0_i32, %c0_i32_0 : i32, i32
  }
  func.func @transform_8(%arg0: i32) -> (i32, i32) {
    %c0_i32 = arith.constant 0 : i32
    %c0_i32_0 = arith.constant 0 : i32
    %c0_i32_1 = arith.constant 0 : i32
    return %c0_i32, %c0_i32_0 : i32, i32
  }
  func.func @transform_9(%arg0: i32) -> (i32, i32) {
    %c0_i32 = arith.constant 0 : i32
    %c0_i32_0 = arith.constant 0 : i32
    %c0_i32_1 = arith.constant 0 : i32
    return %c0_i32, %c0_i32_0 : i32, i32
  }
  func.func @transform_10(%arg0: i32) -> (i32, i32) {
    %c0_i32 = arith.constant 0 : i32
    %c0_i32_0 = arith.constant 0 : i32
    %c0_i32_1 = arith.constant 0 : i32
    return %c0_i32, %c0_i32_0 : i32, i32
  }
  func.func @transform_11(%arg0: i32) -> (i32, i32) {
    %c0_i32 = arith.constant 0 : i32
    %c0_i32_0 = arith.constant 0 : i32
    %c0_i32_1 = arith.constant 0 : i32
    return %c0_i32, %c0_i32_0 : i32, i32
  }
  func.func @transform_12(%arg0: i32) -> (i32, i32) {
    %c0_i32 = arith.constant 0 : i32
    %c0_i32_0 = arith.constant 0 : i32
    %c0_i32_1 = arith.constant 0 : i32
    return %c0_i32, %c0_i32_0 : i32, i32
  }
  func.func @transform_13(%arg0: i32) -> (i32, i32) {
    %c0_i32 = arith.constant 0 : i32
    %c0_i32_0 = arith.constant 0 : i32
    %c0_i32_1 = arith.constant 0 : i32
    return %c0_i32, %c0_i32_0 : i32, i32
  }
  func.func @transform_14(%arg0: i32) -> (i32, i32) {
    %c0_i32 = arith.constant 0 : i32
    %c0_i32_0 = arith.constant 0 : i32
    %c0_i32_1 = arith.constant 0 : i32
    return %c0_i32, %c0_i32_0 : i32, i32
  }
  func.func @transform_15(%arg0: i32) -> (i32, i32) {
    %c0_i32 = arith.constant 0 : i32
    %c0_i32_0 = arith.constant 0 : i32
    %c0_i32_1 = arith.constant 0 : i32
    return %c0_i32, %c0_i32_0 : i32, i32
  }
  func.func @transform_16(%arg0: i32) -> (i32, i32) {
    %c0_i32 = arith.constant 0 : i32
    %c0_i32_0 = arith.constant 0 : i32
    %c0_i32_1 = arith.constant 0 : i32
    return %c0_i32, %c0_i32_0 : i32, i32
  }
  func.func @transform_17(%arg0: i32) -> (i32, i32, i32) {
    %c0_i32 = arith.constant 0 : i32
    %c0_i32_0 = arith.constant 0 : i32
    %c0_i32_1 = arith.constant 0 : i32
    return %arg0, %c0_i32, %c0_i32_0 : i32, i32, i32
  }
  func.func @transform_18(%arg0: i32) -> (i32, i32, i32, i32) {
    %c0_i32 = arith.constant 0 : i32
    %c0_i32_0 = arith.constant 0 : i32
    %c0_i32_1 = arith.constant 0 : i32
    %c0_i32_2 = arith.constant 0 : i32
    return %arg0, %c0_i32, %c0_i32_0, %c0_i32_1 : i32, i32, i32, i32
  }
}

</mosaic_0001>

<bundles_post_ra>
// kernel: tpu_custom_call.1
= control target key start
LH: loop header
LB: loop body
LE: loop exit
PB: predicated region body
PF: predicated region fallthrough
CT: control target
= control target key end

     0   :  { %s3072_s0 = inlined_call_operand.hbm [shape: f32[2,8,32], index: 0, kind: input, shape index: {}]   ;;  %s3073_s1 = inlined_call_operand.vmem [shape: f32[32,32], index: 1, kind: input, shape index: {}]   ;;  %s3074_s2 = inlined_call_operand.vmem [shape: f32[1,32], index: 2, kind: input, shape index: {}]   ;;  %s3075_s3 = inlined_call_operand.vmem [shape: f32[32,32], index: 3, kind: input, shape index: {}]   ;;  %s3076_s4 = inlined_call_operand.vmem [shape: f32[1,32], index: 4, kind: input, shape index: {}]   ;;  %s3077_s5 = inlined_call_operand.vmem [shape: f32[32,32], index: 5, kind: input, shape index: {}]   ;;  %s3078_s6 = inlined_call_operand.vmem [shape: f32[1,32], index: 6, kind: input, shape index: {}]   ;;  %s3079_s7 = inlined_call_operand.vmem [shape: f32[32,32], index: 7, kind: input, shape index: {}]   ;;  %s3080_s8 = inlined_call_operand.vmem [shape: f32[1,32], index: 8, kind: input, shape index: {}]   ;;  %s3081_s9 = inlined_call_operand.vmem [shape: f32[1,32], index: 9, kind: input, shape index: {}]   ;;  %s3082_s10 = inlined_call_operand.vmem [shape: f32[1,32], index: 10, kind: input, shape index: {}]   ;;  %s3083_s11 = inlined_call_operand.vmem [shape: f32[32,128], index: 11, kind: input, shape index: {}]   ;;  %s3084_s12 = inlined_call_operand.vmem [shape: f32[1,128], index: 12, kind: input, shape index: {}]   ;;  %s3085_s13 = inlined_call_operand.vmem [shape: f32[128,32], index: 13, kind: input, shape index: {}]   ;;  %s3086_s14 = inlined_call_operand.vmem [shape: f32[1,32], index: 14, kind: input, shape index: {}]   ;;  %s3087_s15 = inlined_call_operand.vmem [shape: f32[1,32], index: 15, kind: input, shape index: {}]   ;;  %s3088_s16 = inlined_call_operand.vmem [shape: f32[1,32], index: 16, kind: input, shape index: {}]   ;;  %s3089_s17 = inlined_call_operand.hbm [shape: f32[2,8,32], index: 17, kind: output, shape index: {0}]   ;;  %s3090_s18 = inlined_call_operand.hbm [shape: f32[2,4,8,8], index: 18, kind: output, shape index: {1}]  }
   0x1   :  { %3102 = sst [smem:[#allocation14_spill]] %s3072_s0 }
   0x2   :  { %3103 = sst [smem:[#allocation15_spill]] %s3073_s1 }
   0x3   :  { %3104 = sst [smem:[#allocation16_spill]] %s3074_s2 }
   0x4   :  { %3105 = sst [smem:[#allocation17_spill]] %s3075_s3 }
   0x5   :  { %3106 = sst [smem:[#allocation18_spill]] %s3076_s4 }
   0x6   :  { %3107 = sst [smem:[#allocation19_spill]] %s3077_s5 }
   0x7   :  { %3108 = sst [smem:[#allocation20_spill]] %s3078_s6 }
   0x8   :  { %3109 = sst [smem:[#allocation21_spill]] %s3087_s15 }
   0x9   :  { %3110 = sst [smem:[#allocation22_spill]] %s3088_s16 }
   0xa   :  { %3111 = sst [smem:[#allocation23_spill]] %s3089_s17 }
   0xb   :  { %3112 = sst [smem:[#allocation24_spill]] %s3090_s18 }
   0xc   :  { %24 = vsyncpa [#allocation3], 0 }
   0xd   :  { %26 = vsyncpa [#allocation3 + $0x1], 0 }
   0xe   :  { %27 = vsyncpa [#allocation4], 0 }
   0xf   :  { %29 = vsyncpa [#allocation4 + $0x1], 0 }
  0x10   :  { %30 = vsyncpa [#allocation7], 0 }
  0x11   :  { %32 = vsyncpa [#allocation7 + $0x1], 0  ;;  %s2613_s27 = smov 0   ;;  %s2615_s28 = smov 0  }
  0x12   :  { %s2617_s29 = smov 0   ;;  %s2619_s30 = smov 0  }
  0x13 LB: > { %3113 = sst [smem:[#allocation11_spill]] %s2491_s27  ;;  %s2634_s0 = sadd.s32 4294967295, %s2503_s30   ;;  %s2503_s30 = sphi %s2619_s30, %s3142_s30   ;;  %s2499_s29 = sphi %s2617_s29, %s3146_s29   ;;  %s2495_s28 = sphi %s2615_s28, %s3145_s28   ;;  %s2491_s27 = sphi %s2613_s27, %s3144_s27  }
  0x14   : > { %s2005_s19 = sadd.s32 4294967294, %s2503_s30   ;;  %s2638_s1 = sadd.s32 1, %s2503_s30  }
  0x15   : > { %3114 = sst [smem:[#allocation12_spill]] %s2638_s1  ;;  %s45_s20 = sadd.s32 1, %s2499_s29 }
  0x16   : > { %s42_s21 = ssub.s32 %s2503_s30, %s2638_s1  ;;  %p52_p0 = scmp.ne.s32.totalorder %s2499_s29, %s2495_s28 }
  0x17   : > { %p43_p1 = scmp.eq.s32.totalorder %s42_s21, 0  ;;  %p53_p2 = scmp.eq.s32.totalorder %s2503_s30, 0 }
  0x18   : > { %p58_p3 = scmp.ne.s32.totalorder %s2495_s28, %s2491_s27  ;;  %p59_p4 = scmp.eq.s32.totalorder %s2634_s0, 0 }
  0x19   : > { %s2650_s22 = scalar_select %p43_p1, %s2499_s29, %s45_s20  }
  0x1a   : > { %p2652_p5 = por %p53_p2, %p52_p0  ;;  %p2656_p6 = por %p59_p4, %p58_p3 }
  0x1b   : > { %3115 = sst [smem:[#allocation13_spill]] %s2650_s22  ;;  %p418_p7 = scmp.eq.s32.totalorder %s2634_s0, 1 }
  0x1c   : > { %p424_p8 = scmp.eq.s32.totalorder %s2005_s19, 1  ;;  %p2311_p10 = scmp.lt.s32.totalorder %s2503_s30, 2 }
  0x1d   : > { %p2663_p11 = por %p418_p7, %p52_p0  ;;  %s518_s26 = sand.u32 1, %s2499_s29  }
  0x1e   : > { %p2667_p12 = por %p424_p8, %p58_p3  ;;  %s2009_s20 = sshll.u32 %s2503_s30, 7 }
  0x1f   : > { %s3118_s24 = scalar_select %p2663_p11, 1, 0 }
  0x20   : > { %s3119_s25 = scalar_select %p2667_p12, 1, 0 }
  0x21   : > { %s2008_s21 = sshll.u32 %s518_s26, 3  ;;  %s3120_s27 = sld [smem:[#allocation14_spill]] }
  0x22   : > { %s522_s19 = scalar_lea.vmem [#allocation2], %s2008_s21  ;;  %p2680_p13 = pnand %p2311_p10, %p2652_p5 }
  0x23   : > { %s529_s15 = sshll.u32 %s522_s19, 4  ;;  %s519_s1 = scalar_lea.sflag [#allocation3], %s518_s26  ;;  %s2684_s15 = int_to_ptr.vmem [resolvable:$true] %s529_s15 }
  0x24   : > { %p2377_p3 = pneg %p2680_p13 }
  0x27   : > { %s3121_s17 = smov %s3120_s27  ;;  %s2676_s16 = scalar_lea.hbm %s3120_s27, %s2009_s20 }
  0x28   : > { %s2375_s27 = scalar_lea.hbm %s2676_s16, 128  ;;  %s2380_s20 = scalar_lea.hbm %s3121_s17, 256 }
  0x29   : > { %p2376_p2 = scmp.ne.s32.totalorder %s2676_s16, %s2375_s27  ;;  %p2381_p5 = scmp.lt.u32.totalorder %s2676_s16, %s3121_s17 }
  0x2a   : > { %p2382_p8 = scmp.lt.u32.totalorder %s2380_s20, %s2375_s27  ;;  %p2384_p9 = scmp.lt.u32.totalorder %s2375_s27, %s2676_s16 }
  0x2b   : > { %p2378_p4 = pnand %p2377_p3, %p2376_p2 }
  0x2c   : > { %p2383_p10 = por %p2382_p8, %p2381_p5 }
  0x2d   : > { %p2379_p7 = pneg %p2378_p4 }
  0x2e   : > { %p2385_p0 = por %p2384_p9, %p2383_p10 }
  0x30   : > { %p2386_p1 = pnand %p2385_p0, %p2379_p7 }
  0x32   : > { %2389 = shalt.err (!%p2386_p1)
}
  0x33   : > { %s2390_s26 = scalar_lea.vmem %s2684_s15, 128  ;;  %s2505_s22 = smov [#allocation2]  }
  0x34   : > { %p2391_p2 = scmp.ne.s32.totalorder %s2684_s15, %s2390_s26  ;;  %s2395_s2 = sshll.u32 %s2505_s22, 4  ;;  %s2396_s2 = int_to_ptr.vmem [resolvable:$false] %s2395_s2 }
  0x35   : > { %s2397_s21 = scalar_lea.vmem %s2396_s2, 256  ;;  %p2398_p11 = scmp.lt.s32.totalorder %s2684_s15, %s2396_s2 }
  0x36   : > { %p2393_p4 = pnand %p2391_p2, %p2377_p3  ;;  %p2399_p5 = scmp.lt.s32.totalorder %s2397_s21, %s2390_s26 }
  0x38   : > { %p2394_p12 = pneg %p2393_p4  ;;  %p2400_p8 = por %p2399_p5, %p2398_p11 }
  0x3a   : > { %p2401_p9 = pnand %p2400_p8, %p2394_p12 }
  0x3c   : > { %2404 = shalt.err (!%p2401_p9)
}
  0x3d   : > { %2303 = dma.hbm_to_vmem [thread:$0]  (!%p2680_p13), %s2676_s16, 128, %s2684_s15, %s519_s1  }
  0x3e   : > { %p3123_p0 = scmp.lt.s32.totalorder %s2503_s30, 3  ;;  %p3124_p1 = scmp.ge.s32.totalorder %s2503_s30, 1 }
  0x40   : > { %p535_p3 = pnand %p3124_p1, %p3123_p0 }
  0x41   : > { %s2718_s27 = sand.u32 (!%p535_p3), 1, %s2495_s28  }
  0x42   : > { %538 = sbr.rel (%p535_p3) target bundleno = 2585 (0xa19), region = 88  ;;  %s3099_s20 = sshll.u32 (!%p535_p3), %s2718_s27, 3 }
  0x43   : > { %s541_s19 = scalar_lea.sflag (!%p535_p3), [#allocation3], %s2718_s27  ;;  %s544_s18 = scalar_lea.vmem (!%p535_p3), [#allocation2], %s3099_s20 }
  0x49   : > { %2478 = dma.done.wait (%p2656_p6), %s541_s19, 128  }
  0x4a   : > { %2480 = vsyncadd (%p2656_p6), %s541_s19, 4294967168  ;;  %v2506_v0 = vmov 0.0|0.0   ;;  %vm2507_vm0 = vmmov 0   ;;  %v2508_v1 = vmov 0.0   ;;  %s3125_s1 = sld [smem:[#allocation15_spill]]  ;;  %s3126_s3 = sld [smem:[#allocation17_spill]]  ;;  %v850_v39 = vlaneseq }
  0x4b   : > { %2240 = vmatprep.subr.bf16.mxu1 %v2506_v0  ;;  %2118 = vmatprep.mubr.msk.f32.mxu1 %vm2507_vm0, %v2508_v1  ;;  %v2753_v10 = vld [vmem:[%s544_s18] sm:$0xff]  ;;  %vm614_vm1 = vcmask 261120   ;;  %s3127_s5 = sld [smem:[#allocation19_spill]]  ;;  %s3128_s4 = sld [smem:[#allocation18_spill]]  ;;  %vm855_vm2 = vcmask 64512   ;;  %vm1540_vm4 = vcmask 130048  }
  0x4c   : > { %2153 = vmatprep.subr.mxu0 %v2508_v1  ;;  %2155 = vmatprep.mubr.msk.f32.mxu0 %vm2507_vm0, %v2508_v1  ;;  %s3129_s19 = sld [smem:[#allocation16_spill]]  ;;  %s2509_s15 = smov 112   ;;  %v851_v40 = vshrl.u32 %v850_v39, 7  ;;  %v853_v41 = vand.u32 127, %v850_v39  ;;  %v1545_v39 = vld [vmem:[%s3079_s7 + $0x8] sm:$0xff]  ;;  %vm1542_vm5 = vcmask 195584  }
  0x4d   : > { %s2510_s16 = smov 120   ;;  %s2511_s26 = smov 104  }
  0x4e   : > { %s3130_s6 = sld [smem:[#allocation20_spill]]  ;;  %vm854_vm3 = vcmp.ge.s32.totalorder %v851_v40, %v853_v41  ;;  %s2013_s2 = sshll.u32 %s2718_s27, 5  ;;  %v1546_v41 = vld [vmem:[%s3079_s7 + $0x10] sm:$0xff] }
  0x4f   : > { %s2848_s21 = scalar_lea.vmem [#allocation6], %s2013_s2  ;;  %s3100_s2 = smov 8  }
  0x50   : > { %v603_v2 = vld [vmem:[%s3125_s1] sm:$0xff]  ;;  %v604_v3 = vld [vmem:[%s3125_s1 + $0x8] sm:$0xff]  ;;  %v605_v4 = vld [vmem:[%s3125_s1 + $0x10] sm:$0xff]  ;;  %s2513_s20 = smov 16   ;;  %s2514_s18 = smov 24  }
  0x51   : > { %v2241_v5 = vpack.c.bf16 %v604_v3, %v603_v2  ;;  %v606_v6 = vld [vmem:[%s3125_s1 + $0x18] sm:$0xff]  ;;  %v688_v8 = vld [vmem:[%s3126_s3] sm:$0xff]  ;;  %v689_v9 = vld [vmem:[%s3126_s3 + $0x8] sm:$0xff]  ;;  %s3131_s23 = sld [smem:[#allocation24_spill]]  ;;  %p3132_p11 = scmp.ne.s32.totalorder %s3118_s24, 0 }
  0x52   : > { %v2244_v7 = vpack.c.bf16 %v606_v6, %v605_v4  ;;  %v2247_v11 = vpack.c.bf16 %v689_v9, %v688_v8  ;;  %v690_v12 = vld [vmem:[%s3126_s3 + $0x10] sm:$0xff]  ;;  %v691_v13 = vld [vmem:[%s3126_s3 + $0x18] sm:$0xff]  ;;  %v769_v15 = vld [vmem:[%s3127_s5] sm:$0xff] }
  0x53   : > { %2242 = vmatpush3.bf16.msra.mxu1 %v2241_v5  ;;  %v2250_v14 = vpack.c.bf16 %v691_v13, %v690_v12  ;;  %v770_v16 = vld [vmem:[%s3127_s5 + $0x8] sm:$0xff]  ;;  %v771_v18 = vld [vmem:[%s3127_s5 + $0x10] sm:$0xff]  ;;  %v772_v19 = vld [vmem:[%s3127_s5 + $0x18] sm:$0xff] }
  0x54   : > { %2243 = vmatprep.subr.bf16.mxu1 %v2506_v0  ;;  %v2253_v17 = vpack.c.bf16 %v770_v16, %v769_v15  ;;  %v2256_v20 = vpack.c.bf16 %v772_v19, %v771_v18  ;;  %v2016_v23 = vld [vmem:[%s3128_s4] ss:$0 sm:$0xff] }
  0x55   : > { %v2014_v27 = vld [vmem:[%s3129_s19] ss:$0 sm:$0xff]  ;;  %s2515_s19 = smov [#allocation6]  }
  0x56   : > { %v2018_v29 = vld [vmem:[%s3130_s6] ss:$0 sm:$0xff] }
  0x57   : > { %2245 = vmatpush3.bf16.msra.mxu1 %v2244_v7 }
  0x58   : > { %2246 = vmatprep.subr.bf16.mxu1 %v2506_v0 }
  0x5a   : > { %2119 = vmatmul.mubr.msk.f32.vlgmr.msra.gmra.mrb[0].mxu1 %vm614_vm1, %v2753_v10 }
  0x5b   : > { %2248 = vmatpush3.bf16.msra.mxu1 %v2247_v11  ;;  %2129 = vmatprep.mubr.msk.f32.mxu1 %vm2507_vm0, %v2508_v1 }
  0x5c   : > { %2249 = vmatprep.subr.bf16.mxu1 %v2506_v0 }
  0x5f   : > { %2251 = vmatpush3.bf16.msra.mxu1 %v2250_v14 }
  0x60   : > { %2252 = vmatprep.subr.bf16.mxu1 %v2506_v0 }
  0x62   : > { %2130 = vmatmul.mubr.msk.f32.vlgmr.msra.gmra.mrb[2].mxu1 %vm614_vm1, %v2753_v10 }
  0x63   : > { %2254 = vmatpush3.bf16.msra.mxu1 %v2253_v17  ;;  %2140 = vmatprep.mubr.msk.f32.mxu1 %vm2507_vm0, %v2508_v1 }
  0x64   : > { %2255 = vmatprep.subr.bf16.mxu1 %v2506_v0 }
  0x67   : > { %2257 = vmatpush3.bf16.msra.mxu1 %v2256_v20 }
  0x68   : > { %2143 = vmatprep.subr.mxu1 %v2508_v1 }
  0x6a   : > { %2141 = vmatmul.mubr.msk.f32.vlgmr.msra.gmra.mrb[4].mxu1 %vm614_vm1, %v2753_v10 }
  0x6b   : > { %2145 = vmatprep.mubr.msk.f32.mxu1 %vm2507_vm0, %v2508_v1 }
 0x12d   : > { %v684_v21 = vpop.f32.mrb[0].mxu1 }
 0x12e   : > { %v2120_v22 = vpop.f32.mrb[1].mxu1  ;;  %v685_v28 = vadd.f32 %v2014_v27, %v684_v21 }
 0x135   : > { %v765_v24 = vpop.f32.mrb[2].mxu1 }
 0x136   : > { %v766_v25 = vadd.f32 %v2016_v23, %v765_v24  ;;  %v2131_v26 = vpop.f32.mrb[3].mxu1 }
 0x138   : > { %1191 = vrot.lane.b32.xlu1 %v766_v25, %s2509_s15  ;;  %1021 = vrot.lane.b32.xlu0 %v766_v25, %s2510_s16 }
 0x139   : > { %2144 = vmatpush3.xpose.msk.msra.mxu1 %vm855_vm2, %v766_v25 }
 0x13a   : > { %2148 = vmatprep.subr.mxu1 %v2508_v1 }
 0x13c   : > { %2146 = vmatmul.mubr.msk.f32.vlgmr.msra.gmra.mrb[6].mxu1 %vm855_vm2, %v685_v28  ;;  %1189 = vrot.lane.b32.xlu1 %v685_v28, %s2509_s15 }
 0x13d   : > { %1019 = vrot.lane.b32.xlu0 %v685_v28, %s2510_s16  ;;  %2150 = vmatprep.mubr.msk.f32.mxu1 %vm2507_vm0, %v2508_v1  ;;  %v846_v30 = vpop.f32.mrb[4].mxu1 }
 0x13e   : > { %v2810_v31 = vadd.f32 %v2018_v29, %v846_v30  ;;  %v2142_v32 = vpop.f32.mrb[5].mxu1 }
 0x140   : > { %1358 = vrot.lane.b32.xlu1 %v685_v28, %s2511_s26  ;;  %2149 = vmatpush3.msra.mxu1 %v2810_v31 }
 0x141   : > { %1360 = vrot.lane.b32.xlu0 %v766_v25, %s2511_s26  ;;  %2158 = vmatprep.subr.mxu1 %v2508_v1 }
 0x1aa   : > { %v1022_v33 = vpop.permute.xlu0 %1021  ;;  %v1192_v34 = vpop.permute.xlu1 %1191 }
 0x1ab   : > { %2154 = vmatpush3.xpose.msk.msra.mxu0 %vm855_vm2, %v1022_v33 }
 0x1ac   : > { %2163 = vmatprep.subr.mxu0 %v2508_v1 }
 0x1ae   : > { %v1190_v36 = vpop.permute.xlu1 %1189 }
 0x1af   : > { %v1020_v35 = vpop.permute.xlu0 %1019 }
 0x1b0   : > { %2156 = vmatmul.mubr.msk.f32.vlgmr.msra.gmra.mrb[0].mxu0 %vm855_vm2, %v1020_v35 }
 0x1b1   : > { %2164 = vmatpush3.xpose.msk.msra.mxu0 %vm855_vm2, %v1192_v34  ;;  %2165 = vmatprep.mubr.msk.f32.mxu0 %vm2507_vm0, %v2508_v1 }
 0x1b2   : > { %2173 = vmatprep.subr.mxu0 %v2508_v1  ;;  %v1359_v38 = vpop.permute.xlu1 %1358 }
 0x1b3   : > { %v1361_v37 = vpop.permute.xlu0 %1360 }
 0x1b4   : > { %2166 = vmatmul.mubr.msk.f32.vlgmr.msra.gmra.mrb[2].mxu0 %vm855_vm2, %v1190_v36 }
 0x1b5   : > { %2174 = vmatpush3.xpose.msk.msra.mxu0 %vm855_vm2, %v1361_v37  ;;  %2175 = vmatprep.mubr.msk.f32.mxu0 %vm2507_vm0, %v2508_v1 }
 0x1b6   : > { %2258 = vmatprep.subr.bf16.mxu0 %v2506_v0 }
 0x1b8   : > { %2176 = vmatmul.mubr.msk.f32.vlgmr.msra.gmra.mrb[4].mxu0 %vm855_vm2, %v1359_v38  ;;  %v1544_v38 = vld [vmem:[%s3079_s7] sm:$0xff] }
 0x1b9   : > { %2191 = vmatprep.mubr.msk.f32.mxu0 %vm2507_vm0, %v2508_v1  ;;  %v2259_v40 = vpack.c.bf16 %v1545_v39, %v1544_v38 }
 0x1bb   : > { %2260 = vmatpush3.bf16.msra.mxu0 %v2259_v40  ;;  %v1759_v40 = vld [vmem:[%s3085_s13 + $0x78] sm:$0xff] }
 0x1bc   : > { %2261 = vmatprep.subr.bf16.mxu0 %v2506_v0 }
 0x20f   : > { %v928_v42 = vpop.f32.mrb[6].mxu1 }
 0x210   : > { %v932_v43 = vmul.f32 0.35355338, %v928_v42  ;;  %v2147_v44 = vpop.f32.mrb[7].mxu1  ;;  %v1547_v42 = vld [vmem:[%s3079_s7 + $0x18] sm:$0xff] }
 0x212   : > { %v933_v45 = vsel %vm854_vm3, %v932_v43, -1e+09  ;;  %v2262_v43 = vpack.c.bf16 %v1547_v42, %v1546_v41  ;;  %v2039_v42 = vld [vmem:[%s3084_s12] ss:$0 sm:$0xff] }
 0x213   : > { %v934_v46 = vsel %vm855_vm2, %v933_v45, -inf }
 0x214   : > { %935 = vmax.xlane.f32.xlu0 %v934_v46  ;;  %2263 = vmatpush3.bf16.msra.mxu0 %v2262_v43 }
 0x215   : > { %2270 = vmatprep.subr.bf16.mxu0 %v2506_v0 }
 0x283   : > { %v1093_v47 = vpop.f32.mrb[0].mxu0 }
 0x284   : > { %v1097_v48 = vmul.f32 0.35355338, %v1093_v47  ;;  %v2157_v49 = vpop.f32.mrb[1].mxu0 }
 0x286   : > { %v1098_v50 = vsel %vm854_vm3, %v1097_v48, -1e+09 }
 0x287   : > { %v1263_v51 = vpop.f32.mrb[2].mxu0  ;;  %v1099_v52 = vsel %vm855_vm2, %v1098_v50, -inf }
 0x288   : > { %v1267_v53 = vmul.f32 0.35355338, %v1263_v51  ;;  %1100 = vmax.xlane.f32.xlu1 %v1099_v52  ;;  %v2167_v54 = vpop.f32.mrb[3].mxu0 }
 0x28a   : > { %v1268_v55 = vsel %vm854_vm3, %v1267_v53, -1e+09 }
 0x28b   : > { %v1432_v56 = vpop.f32.mrb[4].mxu0  ;;  %v1269_v57 = vsel %vm855_vm2, %v1268_v55, -inf }
 0x28c   : > { %v1436_v58 = vmul.f32 0.35355338, %v1432_v56  ;;  %v2177_v59 = vpop.f32.mrb[5].mxu0  ;;  %1270 = vmax.xlane.f32.xlu0 %v1269_v57  ;;  %v2035_v56 = vld [vmem:[%s3080_s8] ss:$0 sm:$0xff] }
 0x28e   : > { %v1437_v60 = vsel %vm854_vm3, %v1436_v58, -1e+09 }
 0x28f   : > { %v1438_v61 = vsel %vm855_vm2, %v1437_v60, -inf }
 0x290   : > { %1439 = vmax.xlane.f32.xlu0 %v1438_v61 }
 0x299   : > { %1113 = vrot.lane.b32.xlu1 %v2810_v31, %s2510_s16  ;;  %s2051_s16 = sshll.u32 %s2634_s0, 9 }
 0x29a   : > { %s2986_s22 = scalar_lea.hbm %s3131_s23, %s2051_s16 }
 0x2a1   : > { %v936_v62 = vpop.xlane.xlu0 %935 }
 0x2a2   : > { %v937_v63 = vsub.f32 %v933_v45, %v936_v62 }
 0x2a4   : > { %v938_v2 = vmul.f32 1.442695, %v937_v63 }
 0x2a6   : > { %2355 = vpow2.f32 %v938_v2 }
 0x2b0   : > { %v2356_v3 = vpop.eup %2355 }
 0x2b1   : > { %v940_v4 = vsel %vm855_vm2, %v2356_v3, 0.0 }
 0x2bd   : > { %941 = vadd.xlane.f32.xlu1 %v940_v4 }
 0x315   : > { %v1101_v5 = vpop.xlane.xlu1 %1100 }
 0x316   : > { %v1102_v6 = vsub.f32 %v1098_v50, %v1101_v5  ;;  %v1660_v5 = vld [vmem:[%s3083_s11 + $0x8] sm:$0xff] }
 0x318   : > { %v1103_v7 = vmul.f32 1.442695, %v1102_v6 }
 0x319   : > { %v1271_v8 = vpop.xlane.xlu0 %1270  ;;  %v1114_v21 = vpop.permute.xlu1 %1113 }
 0x31a   : > { %2357 = vpow2.f32 %v1103_v7  ;;  %v1272_v9 = vsub.f32 %v1268_v55, %v1271_v8  ;;  %v1662_v7 = vld [vmem:[%s3083_s11 + $0x18] sm:$0xff] }
 0x31c   : > { %v1273_v11 = vmul.f32 1.442695, %v1272_v9  ;;  %v1744_v9 = vld [vmem:[%s3085_s13] sm:$0xff] }
 0x31d   : > { %v1440_v12 = vpop.xlane.xlu0 %1439 }
 0x31e   : > { %2359 = vpow2.f32 %v1273_v11  ;;  %v1441_v13 = vsub.f32 %v1437_v60, %v1440_v12  ;;  %v1745_v11 = vld [vmem:[%s3085_s13 + $0x8] sm:$0xff]  ;;  %v1746_v12 = vld [vmem:[%s3085_s13 + $0x10] sm:$0xff] }
 0x320   : > { %v1442_v14 = vmul.f32 1.442695, %v1441_v13  ;;  %v2271_v13 = vpack.c.bf16 %v1745_v11, %v1744_v9 }
 0x322   : > { %2361 = vpow2.f32 %v1442_v14  ;;  %v1747_v14 = vld [vmem:[%s3085_s13 + $0x18] sm:$0xff] }
 0x324   : > { %v2358_v15 = vpop.eup %2357 }
 0x325   : > { %v1105_v16 = vsel %vm855_vm2, %v2358_v15, 0.0 }
 0x326   : > { %1106 = vadd.xlane.f32.xlu0 %v1105_v16  ;;  %v1748_v16 = vld [vmem:[%s3085_s13 + $0x20] sm:$0xff] }
 0x328   : > { %v2360_v17 = vpop.eup %2359 }
 0x329   : > { %v1275_v18 = vsel %vm855_vm2, %v2360_v17, 0.0 }
 0x32a   : > { %1276 = vadd.xlane.f32.xlu1 %v1275_v18 }
 0x32c   : > { %v2362_v19 = vpop.eup %2361 }
 0x32d   : > { %v1444_v20 = vsel %vm855_vm2, %v2362_v19, 0.0 }
 0x32e   : > { %1445 = vadd.xlane.f32.xlu0 %v1444_v20  ;;  %v1751_v20 = vld [vmem:[%s3085_s13 + $0x38] sm:$0xff] }
 0x33b   : > { %1451 = vrot.lane.b32.xlu1 %v2810_v31, %s2511_s26  ;;  %s1900_s26 = sshll.u32 %s2848_s21, 4  ;;  %s2988_s26 = int_to_ptr.vmem [resolvable:$true] %s1900_s26 }
 0x344   : > { %1282 = vrot.lane.b32.xlu0 %v2810_v31, %s2509_s15  ;;  %s2409_s15 = sshll.u32 %s2515_s19, 4  ;;  %s2410_s15 = int_to_ptr.vmem [resolvable:$false] %s2409_s15 }
 0x345   : > { %p2412_p7 = scmp.lt.s32.totalorder %s2988_s26, %s2410_s15 }
 0x34a   : > { %v942_v22 = vpop.xlane.xlu1 %941 }
 0x34b   : > { %2363 = vrcp.f32 %v942_v22  ;;  %v1752_v22 = vld [vmem:[%s3085_s13 + $0x40] sm:$0xff] }
 0x355   : > { %v2364_v23 = vpop.eup %2363 }
 0x356   : > { %v944_v24 = vmul.f32 %v2364_v23, %v2356_v3  ;;  %v1753_v23 = vld [vmem:[%s3085_s13 + $0x48] sm:$0xff] }
 0x358   : > { %945 = vst.msk [vmem:[%s2848_s21] sm:$0xff] %vm855_vm2, %v944_v24  ;;  %2151 = vmatmul.mubr.msk.f32.vlgmr.msra.gmra.mrb[8].mxu1 %vm855_vm2, %v944_v24  ;;  %v2283_v24 = vpack.c.bf16 %v1753_v23, %v1752_v22 }
 0x359   : > { %2159 = vmatpush3.msra.mxu1 %v1114_v21  ;;  %2160 = vmatprep.mubr.msk.f32.mxu1 %vm2507_vm0, %v2508_v1 }
 0x35a   : > { %2168 = vmatprep.subr.mxu1 %v2508_v1 }
 0x3b3   : > { %v1107_v25 = vpop.xlane.xlu0 %1106 }
 0x3b4   : > { %2365 = vrcp.f32 %v1107_v25  ;;  %v1754_v25 = vld [vmem:[%s3085_s13 + $0x50] sm:$0xff] }
 0x3b7   : > { %v1277_v26 = vpop.xlane.xlu1 %1276 }
 0x3b8   : > { %2367 = vrcp.f32 %v1277_v26  ;;  %v1755_v26 = vld [vmem:[%s3085_s13 + $0x58] sm:$0xff] }
 0x3bb   : > { %v1446_v27 = vpop.xlane.xlu0 %1445  ;;  %v1452_v33 = vpop.permute.xlu1 %1451 }
 0x3bc   : > { %2369 = vrcp.f32 %v1446_v27  ;;  %v2286_v27 = vpack.c.bf16 %v1755_v26, %v1754_v25 }
 0x3be   : > { %v2366_v28 = vpop.eup %2365 }
 0x3bf   : > { %v1109_v29 = vmul.f32 %v2366_v28, %v2358_v15  ;;  %v1283_v30 = vpop.permute.xlu0 %1282  ;;  %v2274_v15 = vpack.c.bf16 %v1747_v14, %v1746_v12  ;;  %v1756_v28 = vld [vmem:[%s3085_s13 + $0x60] sm:$0xff] }
 0x3c1   : > { %2025 = vst.msk [vmem:[%s2848_s21 + $0x8] sm:$0xff] %vm855_vm2, %v1109_v29  ;;  %2161 = vmatmul.mubr.msk.f32.vlgmr.msra.gmra.mrb[10].mxu1 %vm855_vm2, %v1109_v29  ;;  %v1757_v29 = vld [vmem:[%s3085_s13 + $0x68] sm:$0xff] }
 0x3c2   : > { %v2368_v31 = vpop.eup %2367  ;;  %2169 = vmatpush3.msra.mxu1 %v1283_v30  ;;  %2170 = vmatprep.mubr.msk.f32.mxu1 %vm2507_vm0, %v2508_v1  ;;  %v2289_v30 = vpack.c.bf16 %v1757_v29, %v1756_v28 }
 0x3c3   : > { %v1279_v32 = vmul.f32 %v2368_v31, %v2360_v17  ;;  %2178 = vmatprep.subr.mxu1 %v2508_v1  ;;  %v1749_v17 = vld [vmem:[%s3085_s13 + $0x28] sm:$0xff] }
 0x3c4   : > { %v2277_v18 = vpack.c.bf16 %v1749_v17, %v1748_v16 }
 0x3c5   : > { %2029 = vst.msk [vmem:[%s2848_s21 + $0x10] sm:$0xff] %vm855_vm2, %v1279_v32  ;;  %2171 = vmatmul.mubr.msk.f32.vlgmr.msra.gmra.mrb[12].mxu1 %vm855_vm2, %v1279_v32 }
 0x3c6   : > { %v2370_v34 = vpop.eup %2369  ;;  %2179 = vmatpush3.msra.mxu1 %v1452_v33  ;;  %2180 = vmatprep.mubr.msk.f32.mxu1 %vm2507_vm0, %v2508_v1 }
 0x3c7   : > { %v1448_v35 = vmul.f32 %v2370_v34, %v2362_v19  ;;  %2264 = vmatprep.subr.bf16.mxu1 %v2506_v0  ;;  %v1750_v19 = vld [vmem:[%s3085_s13 + $0x30] sm:$0xff] }
 0x3c8   : > { %v2280_v21 = vpack.c.bf16 %v1751_v20, %v1750_v19 }
 0x3c9   : > { %2033 = vst.msk [vmem:[%s2848_s21 + $0x18] sm:$0xff] %vm855_vm2, %v1448_v35  ;;  %2181 = vmatmul.mubr.msk.f32.vlgmr.msra.gmra.mrb[14].mxu1 %vm855_vm2, %v1448_v35  ;;  %v2037_v35 = vld [vmem:[%s3081_s9] ss:$0 sm:$0xff]  ;;  %s2411_s21 = scalar_lea.vmem %s2410_s15, 1024 }
 0x3ca   : > { %2202 = vmatprep.mubr.msk.f32.mxu1 %vm2507_vm0, %v2508_v1 }
 0x42b   : > { %v1015_v36 = vpop.f32.mrb[8].mxu1 }
 0x42c   : > { %v2152_v37 = vpop.f32.mrb[9].mxu1 }
 0x42d   : > { %v2038_v37 = vld [vmem:[%s3082_s10] ss:$0 sm:$0xff] }
 0x494   : > { %v1185_v44 = vpop.f32.mrb[10].mxu1 }
 0x495   : > { %1528 = vrot.lane.b32.xlu1 %v1185_v44, %s3100_s2  ;;  %v2162_v45 = vpop.f32.mrb[11].mxu1 }
 0x498   : > { %v1354_v46 = vpop.f32.mrb[12].mxu1 }
 0x499   : > { %1532 = vrot.lane.b32.xlu0 %v1354_v46, %s2513_s20  ;;  %v2172_v47 = vpop.f32.mrb[13].mxu1 }
 0x49a   : > { %v2041_v47 = vld [vmem:[%s3086_s14] ss:$0 sm:$0xff] }
 0x49c   : > { %v1523_v48 = vpop.f32.mrb[14].mxu1 }
 0x49d   : > { %1536 = vrot.lane.b32.xlu1 %v1523_v48, %s2514_s18  ;;  %v2182_v49 = vpop.f32.mrb[15].mxu1  ;;  %s2405_s18 = scalar_lea.vmem %s2988_s26, 512 }
 0x49e   : > { %p2406_p6 = scmp.ne.s32.totalorder %s2988_s26, %s2405_s18  ;;  %p2413_p10 = scmp.lt.s32.totalorder %s2411_s21, %s2405_s18 }
 0x4a0   : > { %p2407_p12 = pnand %p2406_p6, %p3132_p11  ;;  %p2414_p2 = por %p2413_p10, %p2412_p7 }
 0x4a2   : > { %p2408_p13 = pneg %p2407_p12 }
 0x4a4   : > { %p2415_p4 = pnand %p2414_p2, %p2408_p13 }
 0x507   : > { %v1529_v50 = vpop.permute.xlu1 %1528 }
 0x508   : > { %v1539_v52 = vsel %vm855_vm2, %v1015_v36, %v1529_v50 }
 0x50b   : > { %v1533_v51 = vpop.permute.xlu0 %1532 }
 0x50c   : > { %v1541_v53 = vsel %vm1540_vm4, %v1539_v52, %v1533_v51 }
 0x50f   : > { %v1537_v54 = vpop.permute.xlu1 %1536 }
 0x510   : > { %v1543_v55 = vsel %vm1542_vm5, %v1541_v53, %v1537_v54 }
 0x511   : > { %2192 = vmatmul.mubr.msk.f32.vlgmr.msra.gmra.mrb[6].mxu0 %vm614_vm1, %v1543_v55 }
 0x512   : > { %2237 = vmatprep.mubr.msk.f32.mxu0 %vm2507_vm0, %v2508_v1  ;;  %v1659_v1 = vld [vmem:[%s3083_s11] sm:$0xff]  ;;  %2272 = vmatpush3.bf16.msra.mxu0 %v2271_v13 }
 0x513   : > { %v2265_v6 = vpack.c.bf16 %v1660_v5, %v1659_v1  ;;  %2273 = vmatprep.subr.bf16.mxu0 %v2506_v0 }
 0x515   : > { %2266 = vmatpush3.bf16.msra.mxu1 %v2265_v6 }
 0x516   : > { %2267 = vmatprep.subr.bf16.mxu1 %v2506_v0  ;;  %2275 = vmatpush3.bf16.msra.mxu0 %v2274_v15 }
 0x517   : > { %2276 = vmatprep.subr.bf16.mxu0 %v2506_v0 }
 0x51a   : > { %2278 = vmatpush3.bf16.msra.mxu0 %v2277_v18 }
 0x51b   : > { %2279 = vmatprep.subr.bf16.mxu0 %v2506_v0 }
 0x51e   : > { %2281 = vmatpush3.bf16.msra.mxu0 %v2280_v21 }
 0x51f   : > { %2282 = vmatprep.subr.bf16.mxu0 %v2506_v0 }
 0x522   : > { %2284 = vmatpush3.bf16.msra.mxu0 %v2283_v24 }
 0x523   : > { %2285 = vmatprep.subr.bf16.mxu0 %v2506_v0 }
 0x526   : > { %2287 = vmatpush3.bf16.msra.mxu0 %v2286_v27 }
 0x527   : > { %2288 = vmatprep.subr.bf16.mxu0 %v2506_v0 }
 0x52a   : > { %2290 = vmatpush3.bf16.msra.mxu0 %v2289_v30 }
 0x52b   : > { %2291 = vmatprep.subr.bf16.mxu0 %v2506_v0  ;;  %v1758_v0 = vld [vmem:[%s3085_s13 + $0x70] sm:$0xff] }
 0x52c   : > { %v2292_v41 = vpack.c.bf16 %v1759_v40, %v1758_v0 }
 0x52e   : > { %2293 = vmatpush3.bf16.msra.mxu0 %v2292_v41 }
 0x5e4   : > { %v1624_v57 = vpop.f32.mrb[6].mxu0 }
 0x5e5   : > { %v1625_v58 = vadd.f32 %v2035_v56, %v1624_v57  ;;  %v2193_v59 = vpop.f32.mrb[7].mxu0 }
 0x5e7   : > { %v1628_v60 = vadd.f32 %v1625_v58, %v2753_v10  ;;  %v1661_v10 = vld [vmem:[%s3083_s11 + $0x10] sm:$0xff] }
 0x5e8   : > { %v2268_v8 = vpack.c.bf16 %v1662_v7, %v1661_v10 }
 0x5e9   : > { %v1631_v61 = vsel %vm614_vm1, %v1628_v60, 0.0 }
 0x5ea   : > { %1632 = vadd.xlane.f32.xlu0 %v1631_v61  ;;  %2269 = vmatpush3.bf16.msra.mxu1 %v2268_v8 }
 0x677   : > { %v1633_v62 = vpop.xlane.xlu0 %1632 }
 0x678   : > { %v1635_v63 = vmul.f32 0.03125, %v1633_v62 }
 0x67a   : > { %v1636_v2 = vsub.f32 %v1628_v60, %v1635_v63 }
 0x67c   : > { %v1637_v3 = vmul.f32 %v1636_v2, %v1636_v2 }
 0x67e   : > { %v1638_v4 = vsel %vm614_vm1, %v1637_v3, 0.0 }
 0x67f   : > { %1639 = vadd.xlane.f32.xlu1 %v1638_v4 }
 0x70c   : > { %v1640_v31 = vpop.xlane.xlu1 %1639 }
 0x70d   : > { %v1641_v32 = vmul.f32 0.03125, %v1640_v31 }
 0x70f   : > { %v1642_v33 = vadd.f32 1e-05, %v1641_v32 }
 0x711   : > { %2371 = vrsqrt.f32 %v1642_v33 }
 0x71b   : > { %v2372_v34 = vpop.eup %2371 }
 0x71c   : > { %v1644_v36 = vmul.f32 %v2372_v34, %v1636_v2 }
 0x71e   : > { %v1651_v38 = vmul.f32 %v2037_v35, %v1644_v36 }
 0x720   : > { %v1658_v39 = vadd.f32 %v2038_v37, %v1651_v38 }
 0x722   : > { %2203 = vmatmul.mubr.msk.f32.vlgmr.msra.gmra.mrb[16].mxu1 %vm614_vm1, %v1658_v39 }
 0x7f5   : > { %v1739_v43 = vpop.f32.mrb[16].mxu1 }
 0x7f6   : > { %v1740_v44 = vadd.f32 %v2039_v42, %v1739_v43  ;;  %v2204_v45 = vpop.f32.mrb[17].mxu1 }
 0x7f8   : > { %v1743_v46 = vmax.f32 %v1740_v44, 0.0 }
 0x7fa   : > { %2238 = vmatmul.mubr.f32.vlgmr.msra.gmra.mrb[8].mxu0 %v1743_v46 }
 0x8cd   : > { %v1833_v48 = vpop.f32.mrb[8].mxu0 }
 0x8ce   : > { %v1834_v49 = vadd.f32 %v2041_v47, %v1833_v48  ;;  %v2239_v50 = vpop.f32.mrb[9].mxu0 }
 0x8d0   : > { %v1837_v51 = vadd.f32 %v1834_v49, %v1658_v39 }
 0x8d2   : > { %v1840_v52 = vsel %vm614_vm1, %v1837_v51, 0.0 }
 0x8d3   : > { %1841 = vadd.xlane.f32.xlu0 %v1840_v52 }
 0x960   : > { %v1842_v53 = vpop.xlane.xlu0 %1841 }
 0x961   : > { %v1843_v54 = vmul.f32 0.03125, %v1842_v53 }
 0x963   : > { %v1844_v55 = vsub.f32 %v1837_v51, %v1843_v54 }
 0x965   : > { %v1845_v56 = vmul.f32 %v1844_v55, %v1844_v55 }
 0x967   : > { %v1846_v57 = vsel %vm614_vm1, %v1845_v56, 0.0 }
 0x968   : > { %1847 = vadd.xlane.f32.xlu0 %v1846_v57 }
 0x969   : > { %2418 = shalt.err (!%p2415_p4)
}
 0x96a   : > { %s2419_s16 = scalar_lea.hbm %s2986_s22, 512  ;;  %s2423_s19 = scalar_lea.hbm %s3131_s23, 1024 }
 0x96b   : > { %p2420_p5 = scmp.ne.s32.totalorder %s2986_s22, %s2419_s16  ;;  %p2424_p0 = scmp.lt.u32.totalorder %s2986_s22, %s3131_s23 }
 0x96c   : > { %p2425_p1 = scmp.lt.u32.totalorder %s2423_s19, %s2419_s16  ;;  %p2427_p6 = scmp.lt.u32.totalorder %s2419_s16, %s2986_s22 }
 0x96d   : > { %p2421_p8 = pnand %p2420_p5, %p3132_p11 }
 0x96e   : > { %p2426_p3 = por %p2425_p1, %p2424_p0 }
 0x96f   : > { %p2422_p9 = pneg %p2421_p8 }
 0x970   : > { %p2428_p12 = por %p2427_p6, %p2426_p3 }
 0x972   : > { %p2429_p13 = pnand %p2428_p12, %p2422_p9 }
 0x974   : > { %2432 = shalt.err (!%p2429_p13)
}
 0x975   : > { %s2516_s18 = smov 128   ;;  %s3133_s21 = smov 8  }
 0x976   : > { %s3134_s3 = scalar_lea.sflag [#allocation7], %s2718_s27  ;;  %s3135_s1 = sld [smem:[#allocation21_spill]] }
 0x977   : > { %2297 = dma.vmem_to_hbm [thread:$0]  (%p3132_p11), %s2988_s26, 512, %s2986_s22, %s3134_s3, %s2516_s18, %s2516_s18, %s3133_s21  }
 0x978   : > { %s3136_s15 = sld [smem:[#allocation22_spill]]  ;;  %s2046_s4 = sshll.u32 %s2634_s0, 7 }
 0x979   : > { %s3137_s5 = sshll.u32 %s2718_s27, 3  ;;  %s3138_s18 = sld [smem:[#allocation23_spill]] }
 0x97a   : > { %s594_s6 = scalar_lea.vmem [#allocation5], %s3137_s5  ;;  %s1869_s20 = scalar_lea.sflag [#allocation4], %s2718_s27 }
 0x97b   : > { %s1887_s3 = sshll.u32 %s594_s6, 4  ;;  %s2517_s5 = smov [#allocation5]   ;;  %s3029_s3 = int_to_ptr.vmem [resolvable:$true] %s1887_s3 }
 0x97c   : > { %v2042_v62 = vld [vmem:[%s3135_s1] ss:$0 sm:$0xff]  ;;  %s2433_s16 = scalar_lea.vmem %s3029_s3, 128  ;;  %s2437_s0 = sshll.u32 %s2517_s5, 4  ;;  %s2438_s0 = int_to_ptr.vmem [resolvable:$false] %s2437_s0 }
 0x97d   : > { %p2434_p7 = scmp.ne.s32.totalorder %s3029_s3, %s2433_s16  ;;  %s2439_s1 = scalar_lea.vmem %s2438_s0, 256 }
 0x97e   : > { %v2043_v2 = vld [vmem:[%s3136_s15] ss:$0 sm:$0xff]  ;;  %p2440_p4 = scmp.lt.s32.totalorder %s3029_s3, %s2438_s0  ;;  %p2441_p5 = scmp.lt.s32.totalorder %s2439_s1, %s2433_s16 }
 0x97f   : > { %s3027_s21 = scalar_lea.hbm %s3138_s18, %s2046_s4  ;;  %p2435_p10 = pnand %p2434_p7, %p3132_p11 }
 0x980   : > { %p2442_p8 = por %p2441_p5, %p2440_p4 }
 0x981   : > { %p2436_p2 = pneg %p2435_p10 }
 0x983   : > { %p2443_p9 = pnand %p2442_p8, %p2436_p2 }
 0x9f5   : > { %v1848_v58 = vpop.xlane.xlu0 %1847 }
 0x9f6   : > { %v1849_v59 = vmul.f32 0.03125, %v1848_v58 }
 0x9f8   : > { %v1850_v60 = vadd.f32 1e-05, %v1849_v59 }
 0x9fa   : > { %2373 = vrsqrt.f32 %v1850_v60 }
 0xa04   : > { %v2374_v61 = vpop.eup %2373 }
 0xa05   : > { %v1852_v63 = vmul.f32 %v2374_v61, %v1844_v55 }
 0xa07   : > { %v1859_v3 = vmul.f32 %v2042_v62, %v1852_v63 }
 0xa09   : > { %v1866_v4 = vadd.f32 %v2043_v2, %v1859_v3 }
 0xa0b   : > { %1867 = vst.msk [vmem:[%s594_s6] sm:$0xff] %vm614_vm1, %v1866_v4 }
 0xa0c   : > { %2446 = shalt.err (!%p2443_p9)
}
 0xa0d   : > { %s2447_s4 = scalar_lea.hbm %s3027_s21, 128  ;;  %s2451_s2 = scalar_lea.hbm %s3138_s18, 256 }
 0xa0e   : > { %p2448_p0 = scmp.ne.s32.totalorder %s3027_s21, %s2447_s4  ;;  %p2452_p6 = scmp.lt.u32.totalorder %s3027_s21, %s3138_s18 }
 0xa0f   : > { %p2453_p12 = scmp.lt.u32.totalorder %s2451_s2, %s2447_s4  ;;  %p2455_p7 = scmp.lt.u32.totalorder %s2447_s4, %s3027_s21 }
 0xa10   : > { %p2449_p1 = pnand %p2448_p0, %p3132_p11 }
 0xa11   : > { %p2454_p13 = por %p2453_p12, %p2452_p6 }
 0xa12   : > { %p2450_p3 = pneg %p2449_p1 }
 0xa13   : > { %p2456_p10 = por %p2455_p7, %p2454_p13 }
 0xa15   : > { %p2457_p2 = pnand %p2456_p10, %p2450_p3 }
 0xa17   : > { %2460 = shalt.err (!%p2457_p2)
}
 0xa18   : > { %2296 = dma.vmem_to_hbm [thread:$0]  (%p3132_p11), %s3029_s3, 128, %s3027_s21, %s1869_s20  }
 0xa19 PF: > { %s3139_s26 = sld [smem:[#allocation11_spill]]  ;;  %p3140_p4 = scmp.ne.s32.totalorder %s3119_s25, 0 }
 0xa1a   : > { %p3141_p5 = scmp.ge.s32.totalorder %s2503_s30, 2 }
 0xa1c   : > { %p2305_p8 = pnand %p3141_p5, %p3140_p4 }
 0xa1f   : > { %s1915_s22 = sand.u32 1, %s3139_s26  }
 0xa20   : > { %s1916_s16 = scalar_lea.sflag [#allocation4], %s1915_s22 }
 0xa21   : > { %2482 = dma.done.wait (!%p2305_p8), %s1916_s16, 128  }
 0xa22   : > { %2484 = vsyncadd (!%p2305_p8), %s1916_s16, 4294967168  ;;  %s1925_s5 = scalar_lea.sflag [#allocation7], %s1915_s22 }
 0xa23   : > { %2486 = dma.done.wait (!%p2305_p8), %s1925_s5, 512  }
 0xa24   : > { %2488 = vsyncadd (!%p2305_p8), %s1925_s5, 4294966784  ;;  %s3142_s30 = sld [smem:[#allocation12_spill]]  ;;  %s3143_s24 = sld [smem:[#allocation13_spill]] }
 0xa25   : > { %s3144_s27 = smov %s2495_s28  ;;  %s3145_s28 = smov %s2499_s29 }
 0xa2a   : > { %p35_p11 = scmp.ge.s32.totalorder %s3142_s30, 4   ;;  %s3146_s29 = smov %s3143_s24 }
 0xa2c   :  { %37 = sbr.rel (!%p35_p11) target bundleno = 19 (0x13), region = 153 }
 0xa33   :  { %1930 = vsyncpa [#allocation3], 1 }
 0xa34   :  { %1932 = vsyncpa [#allocation3 + $0x1], 1 }
 0xa35   :  { %1933 = vsyncpa [#allocation4], 1 }
 0xa36   :  { %1935 = vsyncpa [#allocation4 + $0x1], 1 }
 0xa37   :  { %1936 = vsyncpa [#allocation7], 1 }
 0xa38   :  { %1938 = vsyncpa [#allocation7 + $0x1], 1 }

</bundles_post_ra>
